<compile_context>
chip_gen: v6e
topology: v6e:2x2x1
jax: 0.10.0
libtpu: 0.0.40
codegen_flags: <defaults>
</compile_context>

<pallas_src>
import jax
import jax.numpy as jnp
from jax.experimental import pallas as pl
from jax.experimental.pallas import tpu as pltpu


def _round_up(x, m):
    return ((x + m - 1) // m) * m


def _choose_tb(batch, tb_max=1024, sublane=8):
    """Batch tile: as large as possible (amortize per-step overhead) while
    keeping >= 2 tiles when the batch allows it (v7x megacore split)."""
    b_pad = _round_up(batch, sublane)
    half = _round_up((b_pad + 1) // 2, sublane)
    return max(sublane, min(tb_max, half))


def fold_euler_params(wx, wu, b, *, h=1.0):
    """One-time host-side fold of the Euler update into the Linear params:
    Wx' = I + h*Wx, Wu' = h*Wu, b' = h*b, so the kernel is a plain affine map.
    (Free only when h and the block parameters are static across calls.)"""
    nx = wx.shape[0]
    h = jnp.asarray(h, wx.dtype)
    wx_f = jnp.eye(nx, dtype=wx.dtype) + h * wx
    wu_f = h * wu
    b_f = h * b
    return wx_f, wu_f, b_f


# --------------------------------------------------------------------------
# Single Euler step: o = x @ Wx' + u @ Wu' + b'
# --------------------------------------------------------------------------
def _euler_step_kernel(x_ref, u_ref, wx_ref, wu_ref, b_ref, o_ref):
    acc = jnp.dot(x_ref[...], wx_ref[...], preferred_element_type=jnp.float32)
    acc = acc + jnp.dot(u_ref[...], wu_ref[...],
                        preferred_element_type=jnp.float32)
    o_ref[...] = (acc + b_ref[...]).astype(o_ref.dtype)


def euler_integrator(x, u, wx_f, wu_f, b_f, *, tb_max=1024):
    """Forward-Euler step  x + h*(x@Wx + u@Wu + b)  via folded params.

    x: (B, nx), u: (B, nu); wx_f: (nx, nx), wu_f: (nu, nx), b_f: (1, nx)
    from fold_euler_params.  Returns (B, nx).
    """
    B, nx = x.shape
    nu = u.shape[1]
    tb = _choose_tb(B, tb_max)
    b_pad = _round_up(B, tb)
    if b_pad != B:  # only when the batch is not tile-aligned
        x = jnp.pad(x, ((0, b_pad - B), (0, 0)))
        u = jnp.pad(u, ((0, b_pad - B), (0, 0)))

    itemsize = jnp.dtype(x.dtype).itemsize
    out = pl.pallas_call(
        _euler_step_kernel,
        out_shape=jax.ShapeDtypeStruct((b_pad, nx), x.dtype),
        grid=(b_pad // tb,),
        in_specs=[
            pl.BlockSpec((tb, nx), lambda i: (i, 0)),     # x tile (pipelined)
            pl.BlockSpec((tb, nu), lambda i: (i, 0)),     # u tile (pipelined)
            pl.BlockSpec((nx, nx), lambda i: (0, 0)),     # Wx' VMEM-resident
            pl.BlockSpec((nu, nx), lambda i: (0, 0)),     # Wu' VMEM-resident
            pl.BlockSpec((1, nx), lambda i: (0, 0)),      # b'  VMEM-resident
        ],
        out_specs=pl.BlockSpec((tb, nx), lambda i: (i, 0)),
        compiler_params=pltpu.CompilerParams(
            dimension_semantics=("parallel",),
        ),
        cost_estimate=pl.CostEstimate(
            flops=2 * b_pad * (nx + nu) * nx,
            transcendentals=0,
            bytes_accessed=itemsize * (b_pad * (nx + nu) + b_pad * nx
                                       + (nx + nu) * nx + nx),
        ),
    )(x, u, wx_f, wu_f, b_f)
    return out if b_pad == B else out[:B]


# --------------------------------------------------------------------------
# Fused T-step rollout: x stays in a VMEM scratch across the time axis,
# u(t) tiles are streamed, x is written back to HBM only on the last step.
# --------------------------------------------------------------------------
def _euler_rollout_kernel(x0_ref, u_ref, wx_ref, wu_ref, b_ref, o_ref, xs_ref):
    t = pl.program_id(1)

    @pl.when(t == 0)
    def _():
        xs_ref[...] = x0_ref[...].astype(jnp.float32)

    x_new = (
        jnp.dot(xs_ref[...], wx_ref[...], preferred_element_type=jnp.float32)
        + jnp.dot(u_ref[0], wu_ref[...], preferred_element_type=jnp.float32)
        + b_ref[...]
    )
    xs_ref[...] = x_new

    @pl.when(t == pl.num_programs(1) - 1)
    def _():
        o_ref[...] = x_new.astype(o_ref.dtype)


def euler_rollout(x, u_seq, wx_f, wu_f, b_f, *, tb_max=1024):
    """Apply T fused Euler steps.  x: (B, nx), u_seq: (T, B, nu) -> (B, nx)."""
    B, nx = x.shape
    T, _, nu = u_seq.shape
    tb = _choose_tb(B, tb_max)
    b_pad = _round_up(B, tb)
    if b_pad != B:
        x = jnp.pad(x, ((0, b_pad - B), (0, 0)))
        u_seq = jnp.pad(u_seq, ((0, 0), (0, b_pad - B), (0, 0)))

    itemsize = jnp.dtype(x.dtype).itemsize
    out = pl.pallas_call(
        _euler_rollout_kernel,
        out_shape=jax.ShapeDtypeStruct((b_pad, nx), x.dtype),
        grid=(b_pad // tb, T),
        in_specs=[
            pl.BlockSpec((tb, nx), lambda i, t: (i, 0)),      # x0 (read once)
            pl.BlockSpec((1, tb, nu), lambda i, t: (t, i, 0)),  # u(t) streamed
            pl.BlockSpec((nx, nx), lambda i, t: (0, 0)),
            pl.BlockSpec((nu, nx), lambda i, t: (0, 0)),
            pl.BlockSpec((1, nx), lambda i, t: (0, 0)),
        ],
        out_specs=pl.BlockSpec((tb, nx), lambda i, t: (i, 0)),  # resident over t
        scratch_shapes=[pltpu.VMEM((tb, nx), jnp.float32)],     # state accumulator
        compiler_params=pltpu.CompilerParams(
            dimension_semantics=("parallel", "arbitrary"),
        ),
        cost_estimate=pl.CostEstimate(
            flops=2 * T * b_pad * (nx + nu) * nx,
            transcendentals=0,
            bytes_accessed=itemsize * (2 * b_pad * nx + T * b_pad * nu
                                       + (nx + nu) * nx + nx),
        ),
    )(x, u_seq, wx_f, wu_f, b_f)
    return out if b_pad == B else out[:B]


# --------------------------------------------------------------------------
# Pure-JAX references
# --------------------------------------------------------------------------
def euler_integrator_ref(x, u, wx, wu, b, *, h=1.0):
    """x + h * Linear(hstack([x, u]))  — the module's forward semantics."""
    state = jnp.concatenate([x, u], axis=1)          # torch.hstack on 2-D
    w_full = jnp.concatenate([wx, wu], axis=0)       # (nx+nu, nx)
    k1 = state @ w_full + b
    return x + h * k1


if __name__ == "__main__":
    # Small shapes consistent with the module's 2-D x / 2-D u convention.
    # B=256 gives two batch tiles (grid=(2,)) so the pipelined / "parallel"
    # path is actually exercised.
    B, nx, nu, T = 256, 32, 32, 8            # block.in_features=64, out=32
    h = 0.5

    key = jax.random.PRNGKey(0)
    kx, ku, kus, kwx, kwu, kb = jax.random.split(key, 6)

    x = jax.random.normal(kx, (B, nx), dtype=jnp.float32)
    u = jax.random.normal(ku, (B, nu), dtype=jnp.float32)
    u_seq = jax.random.normal(kus, (T, B, nu), dtype=jnp.float32)

    # Deterministic parameter init for the Linear block (in=nx+nu, out=nx),
    # stored transposed and split along the input axis.
    bound = 1.0 / jnp.sqrt(nx + nu)
    wx = jax.random.uniform(kwx, (nx, nx), jnp.float32, -bound, bound)
    wu = jax.random.uniform(kwu, (nu, nx), jnp.float32, -bound, bound)
    b = jax.random.uniform(kb, (1, nx), jnp.float32, -bound, bound)

    # One-time parameter fold (weights are reused, so this is free in practice).
    wx_f, wu_f, b_f = fold_euler_params(wx, wu, b, h=h)

    # ---- single Euler step (the module's forward) ----
    step = jax.jit(euler_integrator)
    out = jax.block_until_ready(step(x, u, wx_f, wu_f, b_f))
    ref = euler_integrator_ref(x, u, wx, wu, b, h=h)
    assert out.shape == (B, nx)
    assert jnp.allclose(out, ref, atol=1e-4, rtol=1e-4), float(
        jnp.max(jnp.abs(out - ref))
    )

    # ---- fused T-step rollout (state stays VMEM-resident across time) ----
    roll = jax.jit(euler_rollout)
    out_r = jax.block_until_ready(roll(x, u_seq, wx_f, wu_f, b_f))
    ref_r = x
    for t in range(T):
        ref_r = euler_integrator_ref(ref_r, u_seq[t], wx, wu, b, h=h)
    assert out_r.shape == (B, nx)
    assert jnp.allclose(out_r, ref_r, atol=1e-4, rtol=1e-4), float(
        jnp.max(jnp.abs(out_r - ref_r))
    )

    print("KERNEL_OK")
</pallas_src>

<mosaic_0001>
module attributes {stable_mosaic.version = 11 : i64} {
  func.func @_euler_step_kernel(%arg0: i32, %arg1: memref<128x32xf32, #tpu.memory_space<vmem>>, %arg2: memref<128x32xf32, #tpu.memory_space<vmem>>, %arg3: memref<32x32xf32, #tpu.memory_space<vmem>>, %arg4: memref<32x32xf32, #tpu.memory_space<vmem>>, %arg5: memref<1x32xf32, #tpu.memory_space<vmem>>, %arg6: memref<128x32xf32, #tpu.memory_space<vmem>>) attributes {dimension_semantics = [#tpu.dimension_semantics<parallel>], iteration_bounds = array<i64: 2>, scalar_prefetch = 0 : i64, scratch_operands = 0 : i64, tpu.core_type = #tpu.core_type<tc>, window_params = [{transform_indices = @transform_0, window_bounds = array<i64: 128, 32>}, {transform_indices = @transform_1, window_bounds = array<i64: 128, 32>}, {pipeline_mode = #tpu.pipeline_mode<synchronous>, transform_indices = @transform_2, window_bounds = array<i64: 32, 32>}, {pipeline_mode = #tpu.pipeline_mode<synchronous>, transform_indices = @transform_3, window_bounds = array<i64: 32, 32>}, {pipeline_mode = #tpu.pipeline_mode<synchronous>, transform_indices = @transform_4, window_bounds = array<i64: 1, 32>}, {transform_indices = @transform_5, window_bounds = array<i64: 128, 32>}]} {
    %c0 = arith.constant 0 : index
    %c0_0 = arith.constant 0 : index
    %0 = vector.load %arg1[%c0, %c0_0] : memref<128x32xf32, #tpu.memory_space<vmem>>, vector<128x32xf32>
    %c0_1 = arith.constant 0 : index
    %c0_2 = arith.constant 0 : index
    %1 = vector.load %arg3[%c0_1, %c0_2] : memref<32x32xf32, #tpu.memory_space<vmem>>, vector<32x32xf32>
    %cst = arith.constant dense<0.000000e+00> : vector<128x32xf32>
    %2 = tpu.matmul %0, %1, %cst {dimension_numbers = #tpu.dot_dimension_numbers<[1], [0], [0], [1], [0, 0, 1, 1], [], []>} : vector<128x32xf32>, vector<32x32xf32>, vector<128x32xf32> -> vector<128x32xf32>
    %c0_3 = arith.constant 0 : index
    %c0_4 = arith.constant 0 : index
    %3 = vector.load %arg2[%c0_3, %c0_4] : memref<128x32xf32, #tpu.memory_space<vmem>>, vector<128x32xf32>
    %c0_5 = arith.constant 0 : index
    %c0_6 = arith.constant 0 : index
    %4 = vector.load %arg4[%c0_5, %c0_6] : memref<32x32xf32, #tpu.memory_space<vmem>>, vector<32x32xf32>
    %cst_7 = arith.constant dense<0.000000e+00> : vector<128x32xf32>
    %5 = tpu.matmul %3, %4, %cst_7 {dimension_numbers = #tpu.dot_dimension_numbers<[1], [0], [0], [1], [0, 0, 1, 1], [], []>} : vector<128x32xf32>, vector<32x32xf32>, vector<128x32xf32> -> vector<128x32xf32>
    %6 = arith.addf %2, %5 : vector<128x32xf32>
    %c0_8 = arith.constant 0 : index
    %c0_9 = arith.constant 0 : index
    %7 = vector.load %arg5[%c0_8, %c0_9] : memref<1x32xf32, #tpu.memory_space<vmem>>, vector<1x32xf32>
    %8 = vector.broadcast %7 : vector<1x32xf32> to vector<128x32xf32>
    %9 = arith.addf %6, %8 : vector<128x32xf32>
    %c0_10 = arith.constant 0 : index
    %c0_11 = arith.constant 0 : index
    %10 = vector.load %arg6[%c0_10, %c0_11] : memref<128x32xf32, #tpu.memory_space<vmem>>, vector<128x32xf32>
    tpu.vector_store %arg6[%c0_10, %c0_11], %9 {strides = array<i32>} : memref<128x32xf32, #tpu.memory_space<vmem>>, vector<128x32xf32>,
    return
  }
  func.func @transform_0(%arg0: i32) -> (i32, i32) {
    %c0_i32 = arith.constant 0 : i32
    %c0_i32_0 = arith.constant 0 : i32
    return %arg0, %c0_i32 : i32, i32
  }
  func.func @transform_1(%arg0: i32) -> (i32, i32) {
    %c0_i32 = arith.constant 0 : i32
    %c0_i32_0 = arith.constant 0 : i32
    return %arg0, %c0_i32 : i32, i32
  }
  func.func @transform_2(%arg0: i32) -> (i32, i32) {
    %c0_i32 = arith.constant 0 : i32
    %c0_i32_0 = arith.constant 0 : i32
    %c0_i32_1 = arith.constant 0 : i32
    return %c0_i32, %c0_i32_0 : i32, i32
  }
  func.func @transform_3(%arg0: i32) -> (i32, i32) {
    %c0_i32 = arith.constant 0 : i32
    %c0_i32_0 = arith.constant 0 : i32
    %c0_i32_1 = arith.constant 0 : i32
    return %c0_i32, %c0_i32_0 : i32, i32
  }
  func.func @transform_4(%arg0: i32) -> (i32, i32) {
    %c0_i32 = arith.constant 0 : i32
    %c0_i32_0 = arith.constant 0 : i32
    %c0_i32_1 = arith.constant 0 : i32
    return %c0_i32, %c0_i32_0 : i32, i32
  }
  func.func @transform_5(%arg0: i32) -> (i32, i32) {
    %c0_i32 = arith.constant 0 : i32
    %c0_i32_0 = arith.constant 0 : i32
    return %arg0, %c0_i32 : i32, i32
  }
}

</mosaic_0001>

<bundles_post_ra>
// kernel: euler_integrator.1
= control target key start
LH: loop header
LB: loop body
LE: loop exit
PB: predicated region body
PF: predicated region fallthrough
CT: control target
= control target key end

     0   :  { %s980_s18 = smov 0   ;;  %s1152_s0 = inlined_call_operand.vmem [shape: f32[256,32], index: 0, kind: input, shape index: {}]   ;;  %s1153_s1 = inlined_call_operand.vmem [shape: f32[256,32], index: 1, kind: input, shape index: {}]   ;;  %s1154_s2 = inlined_call_operand.vmem [shape: f32[32,32], index: 2, kind: input, shape index: {}]   ;;  %s1155_s3 = inlined_call_operand.vmem [shape: f32[32,32], index: 3, kind: input, shape index: {}]   ;;  %s1156_s4 = inlined_call_operand.vmem [shape: f32[1,32], index: 4, kind: input, shape index: {}]   ;;  %s1157_s5 = inlined_call_operand.vmem [shape: f32[256,32], index: 5, kind: output, shape index: {}]  }
   0x1 LB: > { %s784_s19 = sadd.s32 4294967295, %s948_s18   ;;  %p788_p0 = scmp.ge.s32.totalorder %s948_s18, 1  ;;  %s948_s18 = sphi %s980_s18, %s15_s18  }
   0x2   : > { %p199_p1 = scmp.lt.s32.totalorder %s948_s18, 3 }
   0x4   : > { %p200_p2 = pnand %p788_p0, %p199_p1 }
   0x5   : > { %s789_s26 = sshll.u32 (!%p200_p2), %s784_s19, 4 }
   0x6   : > { %203 = sbr.rel (%p200_p2) target bundleno = 250 (0xfa), region = 40  ;;  %p233_p3 = scmp.lt.s32.totalorder (!%p200_p2), %s789_s26, 31 }
   0xb   : > { %v289_v0 = vld [vmem:[%s1155_s3 + $0x18] sm:$0xff]  ;;  %v288_v2 = vld [vmem:[%s1155_s3 + $0x10] sm:$0xff]  ;;  %v287_v4 = vld [vmem:[%s1155_s3 + $0x8] sm:$0xff]  ;;  %s1159_s26 = smov (!%p233_p3, %s789_s26), 31  ;;  %vm290_vm0 = vcmask 261120  }
   0xc   : > { %v269_v1 = vld [vmem:[%s1154_s2 + $0x18] sm:$0xff]  ;;  %870 = vmatprep.subr.mxu0 %v289_v0  ;;  %v268_v3 = vld [vmem:[%s1154_s2 + $0x10] sm:$0xff]  ;;  %v267_v5 = vld [vmem:[%s1154_s2 + $0x8] sm:$0xff]  ;;  %s1012_s12 = sshll.u32 %s1159_s26, 3 }
   0xd   : > { %902 = vmatprep.subr.mxu1 %v269_v1  ;;  %871 = vmatpush3.msra.mxu0 %v289_v0  ;;  %v286_v6 = vld [vmem:[%s1155_s3] sm:$0xff]  ;;  %s1018_s15 = scalar_lea.vmem %s1153_s1, %s1012_s12  ;;  %s1025_s19 = scalar_lea.vmem %s1152_s0, %s1012_s12 }
   0xe   : > { %903 = vmatpush3.msra.mxu1 %v269_v1  ;;  %872 = vmatprep.subr.mxu0 %v288_v2  ;;  %v266_v7 = vld [vmem:[%s1154_s2] sm:$0xff]  ;;  %v271_v9 = vld [vmem:[%s1018_s15 + $0x8] sm:$0xff]  ;;  %v272_v10 = vld [vmem:[%s1018_s15 + $0x10] sm:$0xff]  ;;  %s1099_s24 = scalar_lea.vmem %s1157_s5, %s1012_s12 }
   0xf   : > { %904 = vmatprep.subr.mxu1 %v268_v3  ;;  %873 = vmatpush3.msra.mxu0 %v288_v2  ;;  %v270_v8 = vld [vmem:[%s1018_s15] sm:$0xff]  ;;  %v251_v12 = vld [vmem:[%s1025_s19 + $0x8] sm:$0xff]  ;;  %v252_v13 = vld [vmem:[%s1025_s19 + $0x10] sm:$0xff] }
  0x10   : > { %905 = vmatpush3.msra.mxu1 %v268_v3  ;;  %874 = vmatprep.subr.mxu0 %v287_v4  ;;  %v250_v11 = vld [vmem:[%s1025_s19] sm:$0xff]  ;;  %v273_v14 = vld [vmem:[%s1018_s15 + $0x18] sm:$0xff]  ;;  %v275_v18 = vld [vmem:[%s1018_s15 + $0x28] sm:$0xff] }
  0x11   : > { %906 = vmatprep.subr.mxu1 %v267_v5  ;;  %875 = vmatpush3.msra.mxu0 %v287_v4  ;;  %v253_v15 = vld [vmem:[%s1025_s19 + $0x18] sm:$0xff]  ;;  %v274_v16 = vld [vmem:[%s1018_s15 + $0x20] sm:$0xff]  ;;  %v255_v19 = vld [vmem:[%s1025_s19 + $0x28] sm:$0xff] }
  0x12   : > { %907 = vmatpush3.msra.mxu1 %v267_v5  ;;  %876 = vmatprep.subr.mxu0 %v286_v6  ;;  %v254_v17 = vld [vmem:[%s1025_s19 + $0x20] sm:$0xff]  ;;  %v276_v20 = vld [vmem:[%s1018_s15 + $0x30] sm:$0xff]  ;;  %v277_v22 = vld [vmem:[%s1018_s15 + $0x38] sm:$0xff] }
  0x13   : > { %908 = vmatprep.subr.mxu1 %v266_v7  ;;  %877 = vmatpush3.msra.mxu0 %v286_v6  ;;  %v256_v21 = vld [vmem:[%s1025_s19 + $0x30] sm:$0xff]  ;;  %v257_v23 = vld [vmem:[%s1025_s19 + $0x38] sm:$0xff]  ;;  %v278_v24 = vld [vmem:[%s1018_s15 + $0x40] sm:$0xff] }
  0x14   : > { %878 = vmatprep.mubr.msk.f32.mxu0 %vm290_vm0, %v270_v8  ;;  %909 = vmatpush3.msra.mxu1 %v266_v7  ;;  %v258_v25 = vld [vmem:[%s1025_s19 + $0x40] sm:$0xff]  ;;  %v279_v26 = vld [vmem:[%s1018_s15 + $0x48] sm:$0xff]  ;;  %v280_v28 = vld [vmem:[%s1018_s15 + $0x50] sm:$0xff] }
  0x15   : > { %910 = vmatprep.mubr.msk.f32.mxu1 %vm290_vm0, %v250_v11  ;;  %879 = vmatmul.mubr.msk.f32.vlgmr.msra.gmra.mxu0 %vm290_vm0, %v271_v9  ;;  %v259_v27 = vld [vmem:[%s1025_s19 + $0x48] sm:$0xff]  ;;  %v260_v29 = vld [vmem:[%s1025_s19 + $0x50] sm:$0xff]  ;;  %v281_v30 = vld [vmem:[%s1018_s15 + $0x58] sm:$0xff] }
  0x16   : > { %911 = vmatmul.mubr.msk.f32.vlgmr.msra.gmra.mxu1 %vm290_vm0, %v251_v12  ;;  %881 = vmatprep.mubr.msk.f32.mxu0 %vm290_vm0, %v272_v10  ;;  %v261_v31 = vld [vmem:[%s1025_s19 + $0x58] sm:$0xff]  ;;  %v282_v32 = vld [vmem:[%s1018_s15 + $0x60] sm:$0xff]  ;;  %v283_v34 = vld [vmem:[%s1018_s15 + $0x68] sm:$0xff] }
  0x17   : > { %913 = vmatprep.mubr.msk.f32.mxu1 %vm290_vm0, %v252_v13  ;;  %v262_v33 = vld [vmem:[%s1025_s19 + $0x60] sm:$0xff]  ;;  %v263_v35 = vld [vmem:[%s1025_s19 + $0x68] sm:$0xff]  ;;  %v284_v36 = vld [vmem:[%s1018_s15 + $0x70] sm:$0xff] }
  0x18   : > { %v264_v37 = vld [vmem:[%s1025_s19 + $0x70] sm:$0xff]  ;;  %v285_v38 = vld [vmem:[%s1018_s15 + $0x78] sm:$0xff]  ;;  %v1093_v42 = vld [vmem:[%s1156_s4] ss:$0 sm:$0xff] }
  0x19   : > { %882 = vmatmul.mubr.msk.f32.gmra.mxu0 %vm290_vm0, %v273_v14  ;;  %v265_v39 = vld [vmem:[%s1025_s19 + $0x78] sm:$0xff] }
  0x1a   : > { %914 = vmatmul.mubr.msk.f32.gmra.mxu1 %vm290_vm0, %v253_v15  ;;  %884 = vmatprep.mubr.msk.f32.mxu0 %vm290_vm0, %v274_v16 }
  0x1b   : > { %916 = vmatprep.mubr.msk.f32.mxu1 %vm290_vm0, %v254_v17 }
  0x1d   : > { %885 = vmatmul.mubr.msk.f32.gmra.mxu0 %vm290_vm0, %v275_v18 }
  0x1e   : > { %917 = vmatmul.mubr.msk.f32.gmra.mxu1 %vm290_vm0, %v255_v19  ;;  %887 = vmatprep.mubr.msk.f32.mxu0 %vm290_vm0, %v276_v20 }
  0x1f   : > { %919 = vmatprep.mubr.msk.f32.mxu1 %vm290_vm0, %v256_v21 }
  0x21   : > { %888 = vmatmul.mubr.msk.f32.gmra.mxu0 %vm290_vm0, %v277_v22 }
  0x22   : > { %920 = vmatmul.mubr.msk.f32.gmra.mxu1 %vm290_vm0, %v257_v23  ;;  %890 = vmatprep.mubr.msk.f32.mxu0 %vm290_vm0, %v278_v24 }
  0x23   : > { %922 = vmatprep.mubr.msk.f32.mxu1 %vm290_vm0, %v258_v25 }
  0x25   : > { %891 = vmatmul.mubr.msk.f32.gmra.mxu0 %vm290_vm0, %v279_v26 }
  0x26   : > { %923 = vmatmul.mubr.msk.f32.gmra.mxu1 %vm290_vm0, %v259_v27  ;;  %893 = vmatprep.mubr.msk.f32.mxu0 %vm290_vm0, %v280_v28 }
  0x27   : > { %925 = vmatprep.mubr.msk.f32.mxu1 %vm290_vm0, %v260_v29 }
  0x29   : > { %894 = vmatmul.mubr.msk.f32.gmra.mxu0 %vm290_vm0, %v281_v30 }
  0x2a   : > { %926 = vmatmul.mubr.msk.f32.gmra.mxu1 %vm290_vm0, %v261_v31  ;;  %896 = vmatprep.mubr.msk.f32.mxu0 %vm290_vm0, %v282_v32 }
  0x2b   : > { %928 = vmatprep.mubr.msk.f32.mxu1 %vm290_vm0, %v262_v33 }
  0x2d   : > { %897 = vmatmul.mubr.msk.f32.gmra.mxu0 %vm290_vm0, %v283_v34 }
  0x2e   : > { %929 = vmatmul.mubr.msk.f32.gmra.mxu1 %vm290_vm0, %v263_v35  ;;  %899 = vmatprep.mubr.msk.f32.mxu0 %vm290_vm0, %v284_v36 }
  0x2f   : > { %931 = vmatprep.mubr.msk.f32.mxu1 %vm290_vm0, %v264_v37 }
  0x31   : > { %900 = vmatmul.mubr.msk.f32.gmra.mxu0 %vm290_vm0, %v285_v38 }
  0x32   : > { %932 = vmatmul.mubr.msk.f32.gmra.mxu1 %vm290_vm0, %v265_v39 }
  0xd5   : > { %v880_v40 = vpop.f32.mrf.mxu0 }
  0xd6   : > { %v912_v41 = vpop.f32.mrf.mxu1 }
  0xd7   : > { %v604_v43 = vadd.f32 %v912_v41, %v880_v40  ;;  %v405_v44 = vpop.f32.mrf.mxu0 }
  0xd8   : > { %v598_v45 = vpop.f32.mrf.mxu1 }
  0xd9   : > { %v685_v46 = vadd.f32 %v1093_v42, %v604_v43  ;;  %v599_v47 = vadd.f32 %v598_v45, %v405_v44  ;;  %v883_v48 = vpop.f32.mrf.mxu0 }
  0xda   : > { %v915_v49 = vpop.f32.mrf.mxu1 }
  0xdb   : > { %701 = vst.msk [vmem:[%s1099_s24 + $0x8] sm:$0xff] %vm290_vm0, %v685_v46  ;;  %v684_v50 = vadd.f32 %v1093_v42, %v599_v47  ;;  %v614_v51 = vadd.f32 %v915_v49, %v883_v48  ;;  %v415_v52 = vpop.f32.mrf.mxu0 }
  0xdc   : > { %v608_v53 = vpop.f32.mrf.mxu1 }
  0xdd   : > { %700 = vst.msk [vmem:[%s1099_s24] sm:$0xff] %vm290_vm0, %v684_v50  ;;  %v687_v54 = vadd.f32 %v1093_v42, %v614_v51  ;;  %v609_v55 = vadd.f32 %v608_v53, %v415_v52  ;;  %v886_v56 = vpop.f32.mrf.mxu0 }
  0xde   : > { %v918_v57 = vpop.f32.mrf.mxu1 }
  0xdf   : > { %703 = vst.msk [vmem:[%s1099_s24 + $0x18] sm:$0xff] %vm290_vm0, %v687_v54  ;;  %v686_v58 = vadd.f32 %v1093_v42, %v609_v55  ;;  %v624_v59 = vadd.f32 %v918_v57, %v886_v56  ;;  %v425_v60 = vpop.f32.mrf.mxu0 }
  0xe0   : > { %v618_v61 = vpop.f32.mrf.mxu1 }
  0xe1   : > { %702 = vst.msk [vmem:[%s1099_s24 + $0x10] sm:$0xff] %vm290_vm0, %v686_v58  ;;  %v689_v62 = vadd.f32 %v1093_v42, %v624_v59  ;;  %v619_v63 = vadd.f32 %v618_v61, %v425_v60  ;;  %v889_v0 = vpop.f32.mrf.mxu0 }
  0xe2   : > { %v921_v1 = vpop.f32.mrf.mxu1 }
  0xe3   : > { %705 = vst.msk [vmem:[%s1099_s24 + $0x28] sm:$0xff] %vm290_vm0, %v689_v62  ;;  %v688_v2 = vadd.f32 %v1093_v42, %v619_v63  ;;  %v634_v3 = vadd.f32 %v921_v1, %v889_v0  ;;  %v435_v4 = vpop.f32.mrf.mxu0 }
  0xe4   : > { %v628_v5 = vpop.f32.mrf.mxu1 }
  0xe5   : > { %704 = vst.msk [vmem:[%s1099_s24 + $0x20] sm:$0xff] %vm290_vm0, %v688_v2  ;;  %v691_v6 = vadd.f32 %v1093_v42, %v634_v3  ;;  %v629_v7 = vadd.f32 %v628_v5, %v435_v4  ;;  %v892_v8 = vpop.f32.mrf.mxu0 }
  0xe6   : > { %v924_v9 = vpop.f32.mrf.mxu1 }
  0xe7   : > { %707 = vst.msk [vmem:[%s1099_s24 + $0x38] sm:$0xff] %vm290_vm0, %v691_v6  ;;  %v690_v10 = vadd.f32 %v1093_v42, %v629_v7  ;;  %v644_v11 = vadd.f32 %v924_v9, %v892_v8  ;;  %v445_v12 = vpop.f32.mrf.mxu0 }
  0xe8   : > { %v638_v13 = vpop.f32.mrf.mxu1 }
  0xe9   : > { %706 = vst.msk [vmem:[%s1099_s24 + $0x30] sm:$0xff] %vm290_vm0, %v690_v10  ;;  %v693_v14 = vadd.f32 %v1093_v42, %v644_v11  ;;  %v639_v15 = vadd.f32 %v638_v13, %v445_v12  ;;  %v895_v16 = vpop.f32.mrf.mxu0 }
  0xea   : > { %v927_v17 = vpop.f32.mrf.mxu1 }
  0xeb   : > { %709 = vst.msk [vmem:[%s1099_s24 + $0x48] sm:$0xff] %vm290_vm0, %v693_v14  ;;  %v692_v18 = vadd.f32 %v1093_v42, %v639_v15  ;;  %v654_v19 = vadd.f32 %v927_v17, %v895_v16  ;;  %v455_v20 = vpop.f32.mrf.mxu0 }
  0xec   : > { %v648_v21 = vpop.f32.mrf.mxu1 }
  0xed   : > { %708 = vst.msk [vmem:[%s1099_s24 + $0x40] sm:$0xff] %vm290_vm0, %v692_v18  ;;  %v695_v22 = vadd.f32 %v1093_v42, %v654_v19  ;;  %v649_v23 = vadd.f32 %v648_v21, %v455_v20  ;;  %v898_v24 = vpop.f32.mrf.mxu0 }
  0xee   : > { %v930_v25 = vpop.f32.mrf.mxu1 }
  0xef   : > { %711 = vst.msk [vmem:[%s1099_s24 + $0x58] sm:$0xff] %vm290_vm0, %v695_v22  ;;  %v694_v26 = vadd.f32 %v1093_v42, %v649_v23  ;;  %v664_v27 = vadd.f32 %v930_v25, %v898_v24  ;;  %v465_v28 = vpop.f32.mrf.mxu0 }
  0xf0   : > { %v658_v29 = vpop.f32.mrf.mxu1 }
  0xf1   : > { %710 = vst.msk [vmem:[%s1099_s24 + $0x50] sm:$0xff] %vm290_vm0, %v694_v26  ;;  %v697_v30 = vadd.f32 %v1093_v42, %v664_v27  ;;  %v659_v31 = vadd.f32 %v658_v29, %v465_v28  ;;  %v901_v32 = vpop.f32.mrf.mxu0 }
  0xf2   : > { %v933_v33 = vpop.f32.mrf.mxu1 }
  0xf3   : > { %713 = vst.msk [vmem:[%s1099_s24 + $0x68] sm:$0xff] %vm290_vm0, %v697_v30  ;;  %v696_v34 = vadd.f32 %v1093_v42, %v659_v31  ;;  %v674_v35 = vadd.f32 %v933_v33, %v901_v32  ;;  %v475_v36 = vpop.f32.mrf.mxu0 }
  0xf4   : > { %v668_v37 = vpop.f32.mrf.mxu1 }
  0xf5   : > { %712 = vst.msk [vmem:[%s1099_s24 + $0x60] sm:$0xff] %vm290_vm0, %v696_v34  ;;  %v699_v38 = vadd.f32 %v1093_v42, %v674_v35  ;;  %v669_v39 = vadd.f32 %v668_v37, %v475_v36 }
  0xf7   : > { %715 = vst.msk [vmem:[%s1099_s24 + $0x78] sm:$0xff] %vm290_vm0, %v699_v38  ;;  %v698_v40 = vadd.f32 %v1093_v42, %v669_v39 }
  0xf9   : > { %714 = vst.msk [vmem:[%s1099_s24 + $0x70] sm:$0xff] %vm290_vm0, %v698_v40 }
  0xfa PF: > { %s15_s18 = sadd.s32 1, %s948_s18  }
  0xfb   : > { %p12_p4 = scmp.ge.s32.totalorder %s15_s18, 4  }
  0xfd   :  { %14 = sbr.rel (!%p12_p4) target bundleno = 1 (0x1), region = 73 }

</bundles_post_ra>
